<compile_context>
chip_gen: v7x
topology: tpu7x:2x2x1
jax: 0.10.0
libtpu: 0.0.40
codegen_flags: <defaults>
</compile_context>

<pallas_src>
import functools

import jax
import jax.numpy as jnp
from jax.experimental import pallas as pl
from jax.experimental.pallas import tpu as pltpu


# ---------------------------------------------------------------------------
# Glue: embed a group distance matrix into Euclidean space (classical MDS),
# mirroring gpzoo's _embed_distance_matrix.
# TODO(synk): eigh has no Pallas equivalent; kept in plain JAX (tiny n_groups).
# ---------------------------------------------------------------------------
def embed_distance_matrix(distance_matrix):
    n = distance_matrix.shape[0]
    d2 = distance_matrix.astype(jnp.float32) ** 2
    c = jnp.eye(n, dtype=jnp.float32) - jnp.ones((n, n), jnp.float32) / n
    b = -0.5 * c @ d2 @ c
    w, v = jnp.linalg.eigh(b)
    w = jnp.clip(w, 0.0, None)
    return v * jnp.sqrt(w)[None, :]          # (n_groups, n_groups)


# ---------------------------------------------------------------------------
# Pallas kernel: one (tm, tn) output tile per grid point.
#   a_ref : (tm, D + 2G)  packed [X | coefX | ampX] tile
#   b_ref : (D + G, tn)   packed [Z | one_hot(groupsZ)]^T tile (lane-dense rows)
# Output: exp(coef * dsq) * amp       (pure VPU broadcast math + one EUP exp)
# ---------------------------------------------------------------------------
def _mggp_rbf_kernel(a_ref, b_ref, o_ref, *, d_dim, g_dim):
    a = a_ref[...]                              # (tm, D + 2G)
    b = b_ref[...]                              # (D + G, tn)

    # (1) data squared distance (broadcast-diff; D is tiny so VPU beats MXU).
    dsq = None
    for c in range(d_dim):
        diff = a[:, c:c + 1] - b[c:c + 1, :]    # (tm, tn)
        term = diff * diff
        dsq = term if dsq is None else dsq + term

    # (2) per-group-pair coefficient  coef = (-0.5/ls^2) / (gd*gr2 + 1)
    #     via one-hot bilinear lookup: coefX[i, :] . one_hot(groupZ[j]).
    coef = None
    for g in range(g_dim):
        term = a[:, d_dim + g:d_dim + g + 1] * b[d_dim + g:d_dim + g + 1, :]
        coef = term if coef is None else coef + term

    arg = coef * dsq                            # drops dsq/coef (<=2 live temps)

    # (3) per-group-pair amplitude  amp = sigma^2 * denom^(-input_dim/2).
    amp = None
    for g in range(g_dim):
        term = (a[:, d_dim + g_dim + g:d_dim + g_dim + g + 1]
                * b[d_dim + g:d_dim + g + 1, :])
        amp = term if amp is None else amp + term

    o_ref[...] = (jnp.exp(arg) * amp).astype(o_ref.dtype)


def _round_up(a, b):
    return ((a + b - 1) // b) * b


def mggp_rbf_forward(X, Z, groupsX, groupsZ, embedding,
                     sigma, lengthscale, group_diff_param,
                     *, input_dim=2, tm=512, tn=1024, out_dtype=jnp.float32):
    """MGGP_RBF.forward(X, Z, groupsX, groupsZ) -> (N, M) kernel matrix."""
    X = jnp.asarray(X, jnp.float32)
    Z = jnp.asarray(Z, jnp.float32)
    sigma = jnp.asarray(sigma, jnp.float32)
    lengthscale = jnp.asarray(lengthscale, jnp.float32)
    group_diff = jnp.asarray(group_diff_param, jnp.float32)
    embedding = jnp.asarray(embedding, jnp.float32)

    N, D = X.shape
    M, _ = Z.shape
    G = embedding.shape[0]

    # ---- tiny (G, G) group-pair tables, built with jnp ops (jit/grad safe) ----
    # Note: denom <= 0 (negative group_diff) gives inf/NaN exactly like the
    # reference module; not clamped to preserve semantics.
    ediff = embedding[:, None, :] - embedding[None, :, :]
    gr2_tbl = jnp.sum(ediff * ediff, axis=-1)                    # (G, G)
    denom_tbl = group_diff * gr2_tbl + 1.0
    coef_tbl = (-0.5 / (lengthscale * lengthscale)) / denom_tbl
    amp_tbl = (sigma * sigma) * denom_tbl ** (-0.5 * input_dim)

    # Glue gathers (no Pallas equivalent; tiny).
    coefX = coef_tbl[groupsX]                                    # (N, G)
    ampX = amp_tbl[groupsX]                                      # (N, G)
    oZ = jax.nn.one_hot(groupsZ, G, dtype=jnp.float32)           # (M, G)

    A = jnp.concatenate([X, coefX, ampX], axis=1)                # (N, D + 2G)
    B = jnp.concatenate([Z, oZ], axis=1).T                       # (D + G, M)

    # Tile sizes: large lane-dense output tiles, clamped to the problem size.
    # (On v7x keep tiles at this size: ~2 live full-tile temps + 2x out buffers
    #  stays well under the 64 MiB physical VMEM.)
    tm = _round_up(min(tm, _round_up(N, 8)), 8)
    tn = _round_up(min(tn, _round_up(M, 128)), 128)

    kernel = functools.partial(_mggp_rbf_kernel, d_dim=D, g_dim=G)

    # No pad/slice round trip: cdiv grid + exact out_shape; Pallas masks the
    # ragged last block's writeback.
    return pl.pallas_call(
        kernel,
        out_shape=jax.ShapeDtypeStruct((N, M), out_dtype),
        grid=(pl.cdiv(N, tm), pl.cdiv(M, tn)),
        in_specs=[
            pl.BlockSpec((tm, D + 2 * G), lambda i, j: (i, 0)),   # [X|coefX|ampX]
            pl.BlockSpec((D + G, tn), lambda i, j: (0, j)),       # [Z|oneZ]^T
        ],
        out_specs=pl.BlockSpec((tm, tn), lambda i, j: (i, j)),
        compiler_params=pltpu.CompilerParams(
            dimension_semantics=("parallel", "parallel"),
            vmem_limit_bytes=32 * 1024 * 1024),
    )(A, B)


def mggp_rbf_diag(X, sigma):
    """diag=True branch of the module: sigma^2 broadcast (no kernel needed)."""
    s = jnp.asarray(sigma, jnp.float32)
    return jnp.broadcast_to(s * s, (X.shape[0],))


# pure-JAX reference for verification (mirrors the PyTorch module)
def mggp_rbf_ref(X, Z, groupsX, groupsZ, embedding,
                 sigma, lengthscale, group_diff_param, input_dim=2):
    def sqdist(a, b):
        d = a[:, None, :] - b[None, :, :]
        return jnp.sum(d * d, axis=-1)
    gr2 = sqdist(embedding[groupsX], embedding[groupsZ])
    dsq = sqdist(X, Z)
    denom = group_diff_param * gr2 + 1.0
    scale = denom ** (-0.5 * input_dim)
    dsq = dsq / lengthscale**2
    return sigma**2 * jnp.exp(-0.5 * dsq / denom) * scale


if __name__ == "__main__":
    key = jax.random.PRNGKey(0)
    kx, kz, kgx, kgz = jax.random.split(key, 4)

    # module-style parameters (deterministic init, matching __init__ defaults)
    sigma = 1.0
    lengthscale = 2.0
    group_diff_param = 1.0
    n_groups = 2
    input_dim = 2                                  # RBF.input_dim

    # Non-tile-multiple shapes to exercise the ragged-block path.
    N, M, D = 130, 200, input_dim
    X = jax.random.normal(kx, (N, D), jnp.float32)
    Z = jax.random.normal(kz, (M, D), jnp.float32)
    groupsX = jax.random.randint(kgx, (N,), 0, n_groups)
    groupsZ = jax.random.randint(kgz, (M,), 0, n_groups)

    # embedding = _embed_distance_matrix(ones(n_groups) - eye(n_groups))
    group_distances = jnp.ones((n_groups, n_groups), jnp.float32) - jnp.eye(
        n_groups, dtype=jnp.float32)
    embedding = embed_distance_matrix(group_distances)

    # jit the wrapper with traced hyperparameters (validates the no-float() path).
    fwd = jax.jit(functools.partial(mggp_rbf_forward, input_dim=input_dim))
    out = fwd(X, Z, groupsX, groupsZ, embedding,
              jnp.float32(sigma), jnp.float32(lengthscale),
              jnp.float32(group_diff_param))
    out = jax.block_until_ready(out)

    ref = mggp_rbf_ref(X, Z, groupsX, groupsZ, embedding,
                       sigma, lengthscale, group_diff_param, input_dim)
    assert out.shape == (N, M)
    assert jnp.allclose(out, ref, atol=1e-5, rtol=1e-5), (
        float(jnp.max(jnp.abs(out - ref))))

    # diag branch sanity check
    dg = jax.block_until_ready(mggp_rbf_diag(X, sigma))
    assert dg.shape == (N,) and jnp.allclose(dg, sigma**2)

    print("KERNEL_OK")
</pallas_src>

<mosaic_0001>
module attributes {stable_mosaic.version = 11 : i64} {
  func.func @_mggp_rbf_kernel(%arg0: i32, %arg1: i32, %arg2: memref<136x6xf32, #tpu.memory_space<vmem>>, %arg3: memref<4x256xf32, #tpu.memory_space<vmem>>, %arg4: memref<136x256xf32, #tpu.memory_space<vmem>>) attributes {dimension_semantics = [#tpu.dimension_semantics<parallel>, #tpu.dimension_semantics<parallel>], iteration_bounds = array<i64: 1, 1>, scalar_prefetch = 0 : i64, scratch_operands = 0 : i64, tpu.core_type = #tpu.core_type<tc>, window_params = [{transform_indices = @transform_0, window_bounds = array<i64: 136, 6>}, {transform_indices = @transform_1, window_bounds = array<i64: 4, 256>}, {transform_indices = @transform_2, window_bounds = array<i64: 136, 256>}]} {
    %c0 = arith.constant 0 : index
    %c0_0 = arith.constant 0 : index
    %0 = vector.load %arg2[%c0, %c0_0] : memref<136x6xf32, #tpu.memory_space<vmem>>, vector<136x6xf32>
    %c0_1 = arith.constant 0 : index
    %c0_2 = arith.constant 0 : index
    %1 = vector.load %arg3[%c0_1, %c0_2] : memref<4x256xf32, #tpu.memory_space<vmem>>, vector<4x256xf32>
    %2 = vector.extract_strided_slice %0 {offsets = [0, 0], sizes = [136, 1], strides = [1, 1]} : vector<136x6xf32> to vector<136x1xf32>
    %3 = vector.extract_strided_slice %1 {offsets = [0, 0], sizes = [1, 256], strides = [1, 1]} : vector<4x256xf32> to vector<1x256xf32>
    %4 = vector.broadcast %2 : vector<136x1xf32> to vector<136x256xf32>
    %5 = vector.broadcast %3 : vector<1x256xf32> to vector<136x256xf32>
    %6 = arith.subf %4, %5 : vector<136x256xf32>
    %7 = arith.mulf %6, %6 : vector<136x256xf32>
    %8 = vector.extract_strided_slice %0 {offsets = [0, 1], sizes = [136, 1], strides = [1, 1]} : vector<136x6xf32> to vector<136x1xf32>
    %9 = vector.extract_strided_slice %1 {offsets = [1, 0], sizes = [1, 256], strides = [1, 1]} : vector<4x256xf32> to vector<1x256xf32>
    %10 = vector.broadcast %8 : vector<136x1xf32> to vector<136x256xf32>
    %11 = vector.broadcast %9 : vector<1x256xf32> to vector<136x256xf32>
    %12 = arith.subf %10, %11 : vector<136x256xf32>
    %13 = arith.mulf %12, %12 : vector<136x256xf32>
    %14 = arith.addf %7, %13 : vector<136x256xf32>
    %15 = vector.extract_strided_slice %0 {offsets = [0, 2], sizes = [136, 1], strides = [1, 1]} : vector<136x6xf32> to vector<136x1xf32>
    %16 = vector.extract_strided_slice %1 {offsets = [2, 0], sizes = [1, 256], strides = [1, 1]} : vector<4x256xf32> to vector<1x256xf32>
    %17 = vector.broadcast %15 : vector<136x1xf32> to vector<136x256xf32>
    %18 = vector.broadcast %16 : vector<1x256xf32> to vector<136x256xf32>
    %19 = arith.mulf %17, %18 : vector<136x256xf32>
    %20 = vector.extract_strided_slice %0 {offsets = [0, 3], sizes = [136, 1], strides = [1, 1]} : vector<136x6xf32> to vector<136x1xf32>
    %21 = vector.extract_strided_slice %1 {offsets = [3, 0], sizes = [1, 256], strides = [1, 1]} : vector<4x256xf32> to vector<1x256xf32>
    %22 = vector.broadcast %20 : vector<136x1xf32> to vector<136x256xf32>
    %23 = vector.broadcast %21 : vector<1x256xf32> to vector<136x256xf32>
    %24 = arith.mulf %22, %23 : vector<136x256xf32>
    %25 = arith.addf %19, %24 : vector<136x256xf32>
    %26 = arith.mulf %25, %14 : vector<136x256xf32>
    %27 = vector.extract_strided_slice %0 {offsets = [0, 4], sizes = [136, 1], strides = [1, 1]} : vector<136x6xf32> to vector<136x1xf32>
    %28 = vector.extract_strided_slice %1 {offsets = [2, 0], sizes = [1, 256], strides = [1, 1]} : vector<4x256xf32> to vector<1x256xf32>
    %29 = vector.broadcast %27 : vector<136x1xf32> to vector<136x256xf32>
    %30 = vector.broadcast %28 : vector<1x256xf32> to vector<136x256xf32>
    %31 = arith.mulf %29, %30 : vector<136x256xf32>
    %32 = vector.extract_strided_slice %0 {offsets = [0, 5], sizes = [136, 1], strides = [1, 1]} : vector<136x6xf32> to vector<136x1xf32>
    %33 = vector.extract_strided_slice %1 {offsets = [3, 0], sizes = [1, 256], strides = [1, 1]} : vector<4x256xf32> to vector<1x256xf32>
    %34 = vector.broadcast %32 : vector<136x1xf32> to vector<136x256xf32>
    %35 = vector.broadcast %33 : vector<1x256xf32> to vector<136x256xf32>
    %36 = arith.mulf %34, %35 : vector<136x256xf32>
    %37 = arith.addf %31, %36 : vector<136x256xf32>
    %38 = math.exp %26 : vector<136x256xf32>
    %39 = arith.mulf %38, %37 : vector<136x256xf32>
    %c0_3 = arith.constant 0 : index
    %c0_4 = arith.constant 0 : index
    %40 = vector.load %arg4[%c0_3, %c0_4] : memref<136x256xf32, #tpu.memory_space<vmem>>, vector<136x256xf32>
    tpu.vector_store %arg4[%c0_3, %c0_4], %39 {strides = array<i32>} : memref<136x256xf32, #tpu.memory_space<vmem>>, vector<136x256xf32>,
    return
  }
  func.func @transform_0(%arg0: i32, %arg1: i32) -> (i32, i32) {
    %c0_i32 = arith.constant 0 : i32
    %c0_i32_0 = arith.constant 0 : i32
    return %arg0, %c0_i32 : i32, i32
  }
  func.func @transform_1(%arg0: i32, %arg1: i32) -> (i32, i32) {
    %c0_i32 = arith.constant 0 : i32
    %c0_i32_0 = arith.constant 0 : i32
    return %c0_i32, %arg1 : i32, i32
  }
  func.func @transform_2(%arg0: i32, %arg1: i32) -> (i32, i32) {
    %c0_i32 = arith.constant 0 : i32
    return %arg0, %arg1 : i32, i32
  }
}

</mosaic_0001>

<bundles_post_ra>
// kernel: mggp_rbf_forward.1
= control target key start
LH: loop header
LB: loop body
LE: loop exit
PB: predicated region body
PF: predicated region fallthrough
CT: control target
= control target key end

     0   :  { %v1201_v2 = vmov 0   ;;  %s2165_s0 = inlined_call_operand.vmem [shape: f32[130,6], index: 0, kind: input, shape index: {}]   ;;  %s2166_s1 = inlined_call_operand.vmem [shape: f32[4,200], index: 1, kind: input, shape index: {}]   ;;  %s2167_s2 = inlined_call_operand.hbm [shape: f32[130,200], index: 2, kind: output, shape index: {}]  }
   0x1   :  { %v1228_v0 = vld [vmem:[%s2165_s0 + $0x10] sm:$0xff]  ;;  %v1233_v1 = vld [vmem:[%s2165_s0] sm:$0xff]  ;;  %1098 = vset.pattern.permute.xlu1 %v1201_v2  ;;  %1097 = vset.pattern.permute.xlu0 %v1201_v2  ;;  %v1240_v3 = vld [vmem:[%s2165_s0 + $0x18] sm:$0xff] }
   0x2   :  { %42 = vperm.xlu1 %1098, %v1228_v0   ;;  %32 = vperm.xlu0 %1097, %v1233_v1   ;;  %v1245_v4 = vld [vmem:[%s2165_s0 + $0x8] sm:$0xff] }
   0x6   :  { %47 = vperm.xlu1 %1098, %v1240_v3   ;;  %37 = vperm.xlu0 %1097, %v1245_v4  }
   0x7   :  { %7 = vsyncpa [#allocation3], 0  ;;  %v1252_v5 = vld [vmem:[%s2165_s0 + $0x28] sm:$0xff]  ;;  %v1257_v6 = vld [vmem:[%s2165_s0 + $0x20] sm:$0xff]  ;;  %v1202_v18 = vmov 1   ;;  %v1203_v19 = vmov 2   ;;  %v116_v30 = vlaneseq }
   0x8   :  { %v1264_v7 = vld [vmem:[%s2165_s0 + $0x38] sm:$0xff]  ;;  %v1269_v8 = vld [vmem:[%s2165_s0 + $0x30] sm:$0xff]  ;;  %v1276_v9 = vld [vmem:[%s2165_s0 + $0x48] sm:$0xff]  ;;  %v1204_v20 = vmov 3   ;;  %v1205_v26 = vmov 4  }
   0x9   :  { %v1281_v10 = vld [vmem:[%s2165_s0 + $0x40] sm:$0xff]  ;;  %v1288_v11 = vld [vmem:[%s2165_s0 + $0x58] sm:$0xff]  ;;  %v1293_v12 = vld [vmem:[%s2165_s0 + $0x50] sm:$0xff]  ;;  %v1395_v33 = vshrl.u32 %v116_v30, 7 }
   0xa   :  { %57 = vperm.xlu1 %1098, %v1252_v5   ;;  %52 = vperm.xlu0 %1097, %v1257_v6   ;;  %v1300_v13 = vld [vmem:[%s2165_s0 + $0x68] sm:$0xff]  ;;  %v1305_v14 = vld [vmem:[%s2165_s0 + $0x60] sm:$0xff]  ;;  %v1312_v15 = vld [vmem:[%s2165_s0 + $0x78] sm:$0xff] }
   0xb   :  { %v1317_v16 = vld [vmem:[%s2165_s0 + $0x70] sm:$0xff]  ;;  %v1324_v17 = vld [vmem:[%s2165_s0 + $0x80] sm:$0xff]  ;;  %v118_v36 = vsub.s32 0, %v1395_v33  ;;  %v122_v37 = vsub.s32 4, %v1395_v33  ;;  %v272_v38 = vsub.s32 1, %v1395_v33  ;;  %v276_v39 = vsub.s32 5, %v1395_v33 }
   0xc   :  { %v1411_v40 = vld [vmem:[%s2166_s1] sm:$0xff]  ;;  %s1207_s1 = smov [#allocation2]  }
   0xd   :  { %v119_v43 = vrot.slane %v1411_v40, %v118_v36  ;;  %v123_v44 = vrot.slane %v1411_v40, %v122_v37  ;;  %v273_v45 = vrot.slane %v1411_v40, %v272_v38  ;;  %v277_v46 = vrot.slane %v1411_v40, %v276_v39  ;;  %s1077_s16 = sshll.u32 %s1207_s1, 4  ;;  %s1078_s16 = int_to_ptr.vmem [resolvable:$true] %s1077_s16 }
   0xe   :  { %67 = vperm.xlu1 %1098, %v1264_v7   ;;  %62 = vperm.xlu0 %1097, %v1269_v8   ;;  %s1177_s17 = scalar_lea.vmem %s1078_s16, 4352  ;;  %p1182_p1 = scmp.lt.s32.totalorder %s1078_s16, %s1078_s16 }
   0xf   :  { %v1428_v49 = vrot.slane %v119_v43, %v118_v36  ;;  %v1430_v50 = vrot.slane %v123_v44, %v118_v36  ;;  %v1433_v51 = vrot.slane %v273_v45, %v272_v38  ;;  %v1435_v52 = vrot.slane %v277_v46, %v272_v38  ;;  %p1178_p0 = scmp.ne.s32.totalorder %s1078_s16, %s1177_s17  ;;  %p1183_p2 = scmp.lt.s32.totalorder %s1177_s17, %s1177_s17 }
  0x10   :  { %v1206_v46 = vmov 5  }
  0x11   :  { %p1184_p3 = por %p1183_p2, %p1182_p1 }
  0x12   :  { %77 = vperm.xlu1 %1098, %v1276_v9   ;;  %72 = vperm.xlu0 %1097, %v1281_v10  }
  0x13   :  { %p1185_p4 = pnand %p1184_p3, %p1178_p0 }
  0x16   :  { %87 = vperm.xlu1 %1098, %v1288_v11   ;;  %82 = vperm.xlu0 %1097, %v1293_v12  }
  0x1a   :  { %97 = vperm.xlu1 %1098, %v1300_v13   ;;  %92 = vperm.xlu0 %1097, %v1305_v14  }
  0x1e   :  { %107 = vperm.xlu1 %1098, %v1312_v15   ;;  %102 = vperm.xlu0 %1097, %v1317_v16  }
  0x22   :  { %1099 = vset.pattern.permute.xlu1 %v1202_v18  ;;  %112 = vperm.xlu0 %1097, %v1324_v17  }
  0x23   :  { %203 = vperm.xlu1 %1099, %v1233_v1  }
  0x26   :  { %1100 = vset.pattern.permute.xlu0 %v1202_v18 }
  0x27   :  { %211 = vperm.xlu1 %1099, %v1228_v0   ;;  %207 = vperm.xlu0 %1100, %v1245_v4  }
  0x2b   :  { %215 = vperm.xlu1 %1099, %v1240_v3   ;;  %219 = vperm.xlu0 %1100, %v1257_v6  }
  0x2f   :  { %223 = vperm.xlu1 %1099, %v1252_v5   ;;  %227 = vperm.xlu0 %1100, %v1269_v8  }
  0x33   :  { %231 = vperm.xlu1 %1099, %v1264_v7   ;;  %235 = vperm.xlu0 %1100, %v1281_v10  }
  0x37   :  { %239 = vperm.xlu1 %1099, %v1276_v9   ;;  %243 = vperm.xlu0 %1100, %v1293_v12  }
  0x3b   :  { %247 = vperm.xlu1 %1099, %v1288_v11   ;;  %251 = vperm.xlu0 %1100, %v1305_v14  }
  0x3f   :  { %255 = vperm.xlu1 %1099, %v1300_v13   ;;  %259 = vperm.xlu0 %1100, %v1317_v16  }
  0x43   :  { %263 = vperm.xlu1 %1099, %v1312_v15   ;;  %267 = vperm.xlu0 %1100, %v1324_v17  }
  0x47   :  { %1101 = vset.pattern.permute.xlu1 %v1203_v19  ;;  %1102 = vset.pattern.permute.xlu0 %v1203_v19 }
  0x48   :  { %391 = vperm.xlu1 %1101, %v1233_v1   ;;  %395 = vperm.xlu0 %1102, %v1245_v4  }
  0x4c   :  { %399 = vperm.xlu1 %1101, %v1228_v0   ;;  %407 = vperm.xlu0 %1102, %v1257_v6  }
  0x50   :  { %403 = vperm.xlu1 %1101, %v1240_v3   ;;  %415 = vperm.xlu0 %1102, %v1269_v8  }
  0x54   :  { %411 = vperm.xlu1 %1101, %v1252_v5   ;;  %423 = vperm.xlu0 %1102, %v1281_v10  }
  0x58   :  { %419 = vperm.xlu1 %1101, %v1264_v7   ;;  %431 = vperm.xlu0 %1102, %v1293_v12  }
  0x5c   :  { %427 = vperm.xlu1 %1101, %v1276_v9   ;;  %439 = vperm.xlu0 %1102, %v1305_v14  }
  0x60   :  { %435 = vperm.xlu1 %1101, %v1288_v11   ;;  %447 = vperm.xlu0 %1102, %v1317_v16  }
  0x64   :  { %443 = vperm.xlu1 %1101, %v1300_v13   ;;  %455 = vperm.xlu0 %1102, %v1324_v17  }
  0x68   :  { %451 = vperm.xlu1 %1101, %v1312_v15   ;;  %1104 = vset.pattern.permute.xlu0 %v1204_v20 }
  0x69   :  { %515 = vperm.xlu0 %1104, %v1245_v4  }
  0x6c   :  { %1103 = vset.pattern.permute.xlu1 %v1204_v20 }
  0x6d   :  { %511 = vperm.xlu1 %1103, %v1233_v1   ;;  %527 = vperm.xlu0 %1104, %v1257_v6  }
  0x71   :  { %519 = vperm.xlu1 %1103, %v1228_v0   ;;  %535 = vperm.xlu0 %1104, %v1269_v8  }
  0x75   :  { %523 = vperm.xlu1 %1103, %v1240_v3   ;;  %543 = vperm.xlu0 %1104, %v1281_v10  }
  0x79   :  { %531 = vperm.xlu1 %1103, %v1252_v5   ;;  %551 = vperm.xlu0 %1104, %v1293_v12  }
  0x7d   :  { %539 = vperm.xlu1 %1103, %v1264_v7   ;;  %559 = vperm.xlu0 %1104, %v1305_v14  }
  0x81   :  { %v1372_v21 = vpop.permute.xlu1 %42  ;;  %547 = vperm.xlu1 %1103, %v1276_v9   ;;  %567 = vperm.xlu0 %1104, %v1317_v16   ;;  %v33_v22 = vpop.permute.xlu0 %32 }
  0x82   :  { %v134_v53 = vsub.f32 %v33_v22, %v1428_v49  ;;  %v135_v54 = vsub.f32 %v33_v22, %v1430_v50 }
  0x84   :  { %v168_v59 = vmul.f32 %v134_v53, %v134_v53  ;;  %v169_v60 = vmul.f32 %v135_v54, %v135_v54 }
  0x85   :  { %v1376_v23 = vpop.permute.xlu1 %47  ;;  %555 = vperm.xlu1 %1103, %v1288_v11   ;;  %575 = vperm.xlu0 %1104, %v1324_v17   ;;  %v38_v24 = vpop.permute.xlu0 %37 }
  0x86   :  { %v136_v63 = vsub.f32 %v38_v24, %v1428_v49  ;;  %v137_v2 = vsub.f32 %v38_v24, %v1430_v50 }
  0x88   :  { %v170_v24 = vmul.f32 %v136_v63, %v136_v63  ;;  %v171_v38 = vmul.f32 %v137_v2, %v137_v2 }
  0x89   :  { %v1380_v25 = vpop.permute.xlu1 %57  ;;  %563 = vperm.xlu1 %1103, %v1300_v13   ;;  %1106 = vset.pattern.permute.xlu0 %v1205_v26  ;;  %v53_v27 = vpop.permute.xlu0 %52 }
  0x8a   :  { %703 = vperm.xlu0 %1106, %v1245_v4   ;;  %v142_v36 = vsub.f32 %v53_v27, %v1428_v49  ;;  %v143_v37 = vsub.f32 %v53_v27, %v1430_v50 }
  0x8c   :  { %v176_v27 = vmul.f32 %v142_v36, %v142_v36 }
  0x8d   :  { %v1384_v28 = vpop.permute.xlu1 %67  ;;  %571 = vperm.xlu1 %1103, %v1312_v15   ;;  %v1387_v29 = vpop.permute.xlu0 %62 }
  0x8e   :  { %715 = vperm.xlu0 %1106, %v1257_v6  }
  0x91   :  { %v1390_v31 = vpop.permute.xlu1 %77  ;;  %1105 = vset.pattern.permute.xlu1 %v1205_v26  ;;  %v1392_v32 = vpop.permute.xlu0 %72 }
  0x92   :  { %699 = vperm.xlu1 %1105, %v1233_v1   ;;  %723 = vperm.xlu0 %1106, %v1269_v8  }
  0x95   :  { %v1398_v34 = vpop.permute.xlu1 %87  ;;  %v1400_v35 = vpop.permute.xlu0 %82 }
  0x96   :  { %707 = vperm.xlu1 %1105, %v1228_v0   ;;  %731 = vperm.xlu0 %1106, %v1281_v10  }
  0x99   :  { %v1413_v41 = vpop.permute.xlu1 %97  ;;  %v1415_v42 = vpop.permute.xlu0 %92 }
  0x9a   :  { %711 = vperm.xlu1 %1105, %v1240_v3   ;;  %739 = vperm.xlu0 %1106, %v1293_v12  }
  0x9d   :  { %v1423_v47 = vpop.permute.xlu1 %107  ;;  %v1425_v48 = vpop.permute.xlu0 %102 }
  0x9e   :  { %719 = vperm.xlu1 %1105, %v1252_v5   ;;  %747 = vperm.xlu0 %1106, %v1305_v14  }
  0xa1   :  { %v1439_v55 = vpop.permute.xlu0 %112 }
  0xa2   :  { %727 = vperm.xlu1 %1105, %v1264_v7   ;;  %v204_v56 = vpop.permute.xlu1 %203  ;;  %755 = vperm.xlu0 %1106, %v1317_v16  }
  0xa3   :  { %v288_v57 = vsub.f32 %v204_v56, %v1433_v51  ;;  %v289_v58 = vsub.f32 %v204_v56, %v1435_v52 }
  0xa5   :  { %v322_v61 = vmul.f32 %v288_v57, %v288_v57  ;;  %v323_v62 = vmul.f32 %v289_v58, %v289_v58  ;;  %v177_v58 = vmul.f32 %v143_v37, %v143_v37 }
  0xa6   :  { %735 = vperm.xlu1 %1105, %v1276_v9   ;;  %v1448_v18 = vpop.permute.xlu1 %211  ;;  %v208_v19 = vpop.permute.xlu0 %207  ;;  %763 = vperm.xlu0 %1106, %v1324_v17  }
  0xa7   :  { %v1450_v20 = vadd.f32 %v322_v61, %v168_v59  ;;  %v1452_v22 = vadd.f32 %v323_v62, %v169_v60  ;;  %v290_v26 = vsub.f32 %v208_v19, %v1433_v51  ;;  %v291_v30 = vsub.f32 %v208_v19, %v1435_v52 }
  0xa8   :  { %v146_v59 = vsub.f32 %v1387_v29, %v1428_v49  ;;  %v147_v60 = vsub.f32 %v1387_v29, %v1430_v50  ;;  %v152_v61 = vsub.f32 %v1390_v31, %v1428_v49  ;;  %v153_v62 = vsub.f32 %v1390_v31, %v1430_v50 }
  0xa9   :  { %v324_v39 = vmul.f32 %v290_v26, %v290_v26  ;;  %v325_v43 = vmul.f32 %v291_v30, %v291_v30  ;;  %v150_v26 = vsub.f32 %v1392_v32, %v1428_v49  ;;  %v151_v30 = vsub.f32 %v1392_v32, %v1430_v50 }
  0xaa   :  { %743 = vperm.xlu1 %1105, %v1288_v11   ;;  %v1460_v44 = vpop.permute.xlu1 %215  ;;  %v220_v45 = vpop.permute.xlu0 %219  ;;  %1108 = vset.pattern.permute.xlu0 %v1206_v46  ;;  %v187_v32 = vmul.f32 %v153_v62, %v153_v62 }
  0xab   :  { %v1462_v53 = vadd.f32 %v324_v39, %v170_v24  ;;  %v1464_v54 = vadd.f32 %v325_v43, %v171_v38  ;;  %v296_v56 = vsub.f32 %v220_v45, %v1433_v51  ;;  %v297_v57 = vsub.f32 %v220_v45, %v1435_v52  ;;  %805 = vperm.xlu0 %1108, %v1245_v4  }
  0xac   :  { %v180_v24 = vmul.f32 %v146_v59, %v146_v59  ;;  %v181_v38 = vmul.f32 %v147_v60, %v147_v60  ;;  %v156_v39 = vsub.f32 %v1398_v34, %v1428_v49  ;;  %v157_v43 = vsub.f32 %v1398_v34, %v1430_v50 }
  0xad   :  { %v330_v63 = vmul.f32 %v296_v56, %v296_v56  ;;  %v331_v2 = vmul.f32 %v297_v57, %v297_v57  ;;  %v186_v45 = vmul.f32 %v152_v61, %v152_v61  ;;  %v155_v59 = vsub.f32 %v1400_v35, %v1430_v50 }
  0xae   :  { %751 = vperm.xlu1 %1105, %v1300_v13   ;;  %v1478_v19 = vpop.permute.xlu1 %223  ;;  %v228_v4 = vpop.permute.xlu0 %227 }
  0xaf   :  { %v1484_v29 = vadd.f32 %v330_v63, %v176_v27  ;;  %v1486_v36 = vadd.f32 %v331_v2, %v177_v58  ;;  %v300_v37 = vsub.f32 %v228_v4, %v1433_v51  ;;  %v301_v31 = vsub.f32 %v228_v4, %v1435_v52  ;;  %817 = vperm.xlu0 %1108, %v1257_v6  }
  0xb0   :  { %v184_v63 = vmul.f32 %v150_v26, %v150_v26  ;;  %v185_v2 = vmul.f32 %v151_v30, %v151_v30  ;;  %v154_v6 = vsub.f32 %v1400_v35, %v1428_v49  ;;  %v190_v4 = vmul.f32 %v156_v39, %v156_v39 }
  0xb1   :  { %2171 = vst [vmem:[#allocation5_spill] sm:$0xff] %v1484_v29  ;;  %2172 = vst [vmem:[#allocation6_spill] sm:$0xff] %v1486_v36  ;;  %v334_v56 = vmul.f32 %v300_v37, %v300_v37  ;;  %v335_v57 = vmul.f32 %v301_v31, %v301_v31  ;;  %v191_v37 = vmul.f32 %v157_v43, %v157_v43 }
  0xb2   :  { %759 = vperm.xlu1 %1105, %v1312_v15   ;;  %v1496_v27 = vpop.permute.xlu1 %231  ;;  %v236_v58 = vpop.permute.xlu0 %235  ;;  %v160_v26 = vsub.f32 %v1413_v41, %v1428_v49  ;;  %v161_v30 = vsub.f32 %v1413_v41, %v1430_v50  ;;  %v158_v35 = vsub.f32 %v1415_v42, %v1428_v49  ;;  %v159_v31 = vsub.f32 %v1415_v42, %v1430_v50 }
  0xb3   :  { %2173 = vst [vmem:[#allocation7_spill] sm:$0xff] %v1496_v27  ;;  %v1502_v60 = vadd.f32 %v334_v56, %v180_v24  ;;  %v1504_v34 = vadd.f32 %v335_v57, %v181_v38  ;;  %v304_v61 = vsub.f32 %v236_v58, %v1433_v51  ;;  %v305_v62 = vsub.f32 %v236_v58, %v1435_v52 }
  0xb4   :  { %825 = vperm.xlu0 %1108, %v1269_v8   ;;  %v188_v8 = vmul.f32 %v154_v6, %v154_v6  ;;  %v189_v39 = vmul.f32 %v155_v59, %v155_v59  ;;  %v193_v27 = vmul.f32 %v159_v31, %v159_v31 }
  0xb5   :  { %2174 = vst [vmem:[#allocation8_spill] sm:$0xff] %v1502_v60  ;;  %2175 = vst [vmem:[#allocation9_spill] sm:$0xff] %v1504_v34  ;;  %v338_v24 = vmul.f32 %v304_v61, %v304_v61  ;;  %v339_v38 = vmul.f32 %v305_v62, %v305_v62  ;;  %v195_v61 = vmul.f32 %v161_v30, %v161_v30 }
  0xb6   :  { %1107 = vset.pattern.permute.xlu1 %v1206_v46  ;;  %v240_v56 = vpop.permute.xlu1 %239  ;;  %v244_v57 = vpop.permute.xlu0 %243  ;;  %v194_v46 = vmul.f32 %v160_v26, %v160_v26  ;;  %v192_v62 = vmul.f32 %v158_v35, %v158_v35 }
  0xb7   :  { %v306_v43 = vsub.f32 %v240_v56, %v1433_v51  ;;  %v307_v58 = vsub.f32 %v240_v56, %v1435_v52  ;;  %801 = vperm.xlu1 %1107, %v1233_v1   ;;  %v1520_v41 = vadd.f32 %v338_v24, %v184_v63  ;;  %v1522_v34 = vadd.f32 %v339_v38, %v185_v2 }
  0xb8   :  { %v308_v60 = vsub.f32 %v244_v57, %v1433_v51  ;;  %v309_v42 = vsub.f32 %v244_v57, %v1435_v52  ;;  %833 = vperm.xlu0 %1108, %v1281_v10  }
  0xb9   :  { %v340_v6 = vmul.f32 %v306_v43, %v306_v43  ;;  %v341_v59 = vmul.f32 %v307_v58, %v307_v58 }
  0xba   :  { %v342_v36 = vmul.f32 %v308_v60, %v308_v60  ;;  %v343_v56 = vmul.f32 %v309_v42, %v309_v42  ;;  %v248_v29 = vpop.permute.xlu1 %247  ;;  %v252_v1 = vpop.permute.xlu0 %251 }
  0xbb   :  { %v1527_v63 = vadd.f32 %v340_v6, %v186_v45  ;;  %v1529_v2 = vadd.f32 %v341_v59, %v187_v32  ;;  %v310_v24 = vsub.f32 %v248_v29, %v1433_v51  ;;  %v311_v38 = vsub.f32 %v248_v29, %v1435_v52  ;;  %809 = vperm.xlu1 %1107, %v1228_v0  }
  0xbc   :  { %v1534_v10 = vadd.f32 %v342_v36, %v188_v8  ;;  %v1536_v26 = vadd.f32 %v343_v56, %v189_v39  ;;  %v312_v30 = vsub.f32 %v252_v1, %v1433_v51  ;;  %v313_v60 = vsub.f32 %v252_v1, %v1435_v52  ;;  %841 = vperm.xlu0 %1108, %v1293_v12  }
  0xbd   :  { %v162_v45 = vsub.f32 %v1425_v48, %v1428_v49  ;;  %v163_v32 = vsub.f32 %v1425_v48, %v1430_v50  ;;  %v344_v35 = vmul.f32 %v310_v24, %v310_v24  ;;  %v345_v29 = vmul.f32 %v311_v38, %v311_v38 }
  0xbe   :  { %v164_v0 = vsub.f32 %v1423_v47, %v1428_v49  ;;  %v165_v36 = vsub.f32 %v1423_v47, %v1430_v50  ;;  %v346_v31 = vmul.f32 %v312_v30, %v312_v30  ;;  %v347_v57 = vmul.f32 %v313_v60, %v313_v60  ;;  %v256_v8 = vpop.permute.xlu1 %255  ;;  %v260_v39 = vpop.permute.xlu0 %259 }
  0xbf   :  { %v1549_v43 = vadd.f32 %v344_v35, %v190_v4  ;;  %v1551_v12 = vadd.f32 %v345_v29, %v191_v37  ;;  %v314_v58 = vsub.f32 %v256_v8, %v1433_v51  ;;  %v315_v48 = vsub.f32 %v256_v8, %v1435_v52  ;;  %813 = vperm.xlu1 %1107, %v1240_v3  }
  0xc0   :  { %v1556_v42 = vadd.f32 %v346_v31, %v192_v62  ;;  %v1558_v6 = vadd.f32 %v347_v57, %v193_v27  ;;  %v316_v47 = vsub.f32 %v260_v39, %v1433_v51  ;;  %v317_v59 = vsub.f32 %v260_v39, %v1435_v52  ;;  %849 = vperm.xlu0 %1108, %v1305_v14  }
  0xc1   :  { %v196_v4 = vmul.f32 %v162_v45, %v162_v45  ;;  %v197_v56 = vmul.f32 %v163_v32, %v163_v32  ;;  %v348_v37 = vmul.f32 %v314_v58, %v314_v58  ;;  %v349_v1 = vmul.f32 %v315_v48, %v315_v48 }
  0xc2   :  { %v166_v24 = vsub.f32 %v1439_v55, %v1428_v49  ;;  %v167_v3 = vsub.f32 %v1439_v55, %v1430_v50  ;;  %v350_v62 = vmul.f32 %v316_v47, %v316_v47  ;;  %v351_v38 = vmul.f32 %v317_v59, %v317_v59  ;;  %v264_v27 = vpop.permute.xlu1 %263  ;;  %v268_v30 = vpop.permute.xlu0 %267 }
  0xc3   :  { %v1567_v60 = vadd.f32 %v348_v37, %v194_v46  ;;  %v1569_v35 = vadd.f32 %v349_v1, %v195_v61  ;;  %v318_v14 = vsub.f32 %v264_v27, %v1433_v51  ;;  %v319_v45 = vsub.f32 %v264_v27, %v1435_v52  ;;  %821 = vperm.xlu1 %1107, %v1252_v5  }
  0xc4   :  { %v1574_v32 = vadd.f32 %v350_v62, %v196_v4  ;;  %v1576_v29 = vadd.f32 %v351_v38, %v197_v56  ;;  %v320_v55 = vsub.f32 %v268_v30, %v1433_v51  ;;  %v321_v31 = vsub.f32 %v268_v30, %v1435_v52  ;;  %857 = vperm.xlu0 %1108, %v1317_v16  }
  0xc5   :  { %2176 = vst [vmem:[#allocation10_spill] sm:$0xff] %v1567_v60  ;;  %2177 = vst [vmem:[#allocation11_spill] sm:$0xff] %v1569_v35  ;;  %v198_v46 = vmul.f32 %v164_v0, %v164_v0  ;;  %v199_v57 = vmul.f32 %v165_v36, %v165_v36  ;;  %v352_v61 = vmul.f32 %v318_v14, %v318_v14  ;;  %v584_v27 = vsub.s32 7, %v1395_v33 }
  0xc6   :  { %v353_v8 = vmul.f32 %v319_v45, %v319_v45  ;;  %v200_v39 = vmul.f32 %v166_v24, %v166_v24  ;;  %v201_v58 = vmul.f32 %v167_v3, %v167_v3  ;;  %v354_v48 = vmul.f32 %v320_v55, %v320_v55 }
  0xc7   :  { %v355_v47 = vmul.f32 %v321_v31, %v321_v31  ;;  %v1581_v59 = vadd.f32 %v352_v61, %v198_v46  ;;  %829 = vperm.xlu1 %1107, %v1264_v7   ;;  %v1586_v4 = vpop.permute.xlu1 %391  ;;  %v396_v56 = vpop.permute.xlu0 %395  ;;  %v464_v30 = vsub.s32 6, %v1395_v33  ;;  %v585_v55 = vrot.slane %v1411_v40, %v584_v27 }
  0xc8   :  { %v1583_v5 = vadd.f32 %v353_v8, %v199_v57  ;;  %v1588_v37 = vadd.f32 %v354_v48, %v200_v39  ;;  %865 = vperm.xlu0 %1108, %v1324_v17   ;;  %v138_v31 = vsub.f32 %v1372_v21, %v1428_v49  ;;  %v292_v46 = vsub.f32 %v1448_v18, %v1433_v51 }
  0xc9   :  { %2178 = vst [vmem:[#allocation12_spill] sm:$0xff] %v1581_v59  ;;  %v1590_v16 = vadd.f32 %v355_v47, %v201_v58  ;;  %v465_v61 = vrot.slane %v1411_v40, %v464_v30  ;;  %v139_v39 = vsub.f32 %v1372_v21, %v1430_v50  ;;  %v140_v58 = vsub.f32 %v1376_v23, %v1428_v49 }
  0xca   :  { %2179 = vst [vmem:[#allocation13_spill] sm:$0xff] %v1583_v5  ;;  %2180 = vst [vmem:[#allocation14_spill] sm:$0xff] %v1588_v37  ;;  %v141_v48 = vsub.f32 %v1376_v23, %v1430_v50  ;;  %v293_v47 = vsub.f32 %v1448_v18, %v1435_v52  ;;  %v145_v30 = vsub.f32 %v1380_v25, %v1430_v50 }
  0xcb   :  { %2181 = vst [vmem:[#allocation15_spill] sm:$0xff] %v1590_v16  ;;  %837 = vperm.xlu1 %1107, %v1276_v9   ;;  %v1594_v0 = vpop.permute.xlu1 %399  ;;  %v1596_v36 = vpop.permute.xlu0 %407  ;;  %v148_v21 = vsub.f32 %v1384_v28, %v1428_v49  ;;  %v149_v59 = vsub.f32 %v1384_v28, %v1430_v50  ;;  %v172_v23 = vmul.f32 %v138_v31, %v138_v31 }
  0xcc   :  { %v326_v35 = vmul.f32 %v292_v46, %v292_v46  ;;  %v1665_v16 = vmul.f32 %v141_v48, %v141_v48 }
  0xcd   :  { %v1675_v46 = vmul.f32 %v148_v21, %v148_v21 }
  0xcf   :  { %845 = vperm.xlu1 %1107, %v1288_v11   ;;  %v1599_v1 = vpop.permute.xlu1 %403  ;;  %v1601_v7 = vpop.permute.xlu0 %415  ;;  %v580_v11 = vsub.s32 3, %v1395_v33 }
  0xd1   :  { %v1647_v5 = vrot.slane %v585_v55, %v580_v11  ;;  %v1663_v55 = vmul.f32 %v140_v58, %v140_v58 }
  0xd3   :  { %853 = vperm.xlu1 %1107, %v1300_v13   ;;  %v1604_v24 = vpop.permute.xlu1 %411  ;;  %v1606_v3 = vpop.permute.xlu0 %423  ;;  %v460_v13 = vsub.s32 2, %v1395_v33 }
  0xd5   :  { %v461_v57 = vrot.slane %v1411_v40, %v460_v13  ;;  %v1659_v18 = vrot.slane %v465_v61, %v460_v13  ;;  %v360_v61 = vadd.f32 %v326_v35, %v172_v23 }
  0xd7   :  { %861 = vperm.xlu1 %1107, %v1312_v15   ;;  %v1609_v17 = vpop.permute.xlu1 %419  ;;  %v1611_v9 = vpop.permute.xlu0 %431  ;;  %v581_v15 = vrot.slane %v1411_v40, %v580_v11  ;;  %v144_v40 = vsub.f32 %v1380_v25, %v1428_v49  ;;  %v1657_v60 = vrot.slane %v461_v57, %v460_v13  ;;  %v327_v25 = vmul.f32 %v293_v47, %v293_v47 }
  0xd8   :  { %v1673_v13 = vmul.f32 %v145_v30, %v145_v30  ;;  %v1677_v57 = vmul.f32 %v149_v59, %v149_v59 }
  0xd9   :  { %v1645_v27 = vrot.slane %v581_v15, %v580_v11  ;;  %v173_v15 = vmul.f32 %v139_v39, %v139_v39  ;;  %v478_v49 = vmul.f32 %v1657_v60, %v396_v56  ;;  %v1671_v31 = vmul.f32 %v144_v40, %v144_v40 }
  0xda   :  { %v294_v39 = vsub.f32 %v1460_v44, %v1433_v51  ;;  %v477_v40 = vmul.f32 %v1659_v18, %v1586_v4 }
  0xdb   :  { %v1613_v62 = vpop.permute.xlu1 %427  ;;  %v1615_v38 = vpop.permute.xlu0 %439  ;;  %v361_v47 = vadd.f32 %v327_v25, %v173_v15  ;;  %v485_v15 = vmul.f32 %v1659_v18, %v1596_v36 }
  0xdf   :  { %v1621_v14 = vpop.permute.xlu1 %435  ;;  %v1623_v45 = vpop.permute.xlu0 %447 }
  0xe3   :  { %v1633_v8 = vpop.permute.xlu1 %443  ;;  %v1635_v33 = vpop.permute.xlu0 %455 }
  0xe4   :  { %2182 = vst [vmem:[#allocation16_spill] sm:$0xff] %v1633_v8  ;;  %v479_v8 = vmul.f32 %v1659_v18, %v396_v56  ;;  %v295_v56 = vsub.f32 %v1460_v44, %v1435_v52  ;;  %v484_v44 = vmul.f32 %v1657_v60, %v1596_v36  ;;  %v480_v36 = vmul.f32 %v1657_v60, %v1594_v0 }
  0xe7   :  { %v1661_v11 = vpop.permute.xlu1 %451 }
  0xe8   :  { %2183 = vst [vmem:[#allocation17_spill] sm:$0xff] %v1661_v11  ;;  %v516_v37 = vpop.permute.xlu0 %515 }
  0xe9   :  { %v598_v28 = vmul.f32 %v1645_v27, %v516_v37  ;;  %v599_v50 = vmul.f32 %v1647_v5, %v516_v37  ;;  %v476_v37 = vmul.f32 %v1657_v60, %v1586_v4 }
  0xeb   :  { %v632_v58 = vadd.f32 %v598_v28, %v478_v49  ;;  %v633_v48 = vadd.f32 %v599_v50, %v479_v8  ;;  %v328_v49 = vmul.f32 %v294_v39, %v294_v39  ;;  %v329_v50 = vmul.f32 %v295_v56, %v295_v56 }
  0xec   :  { %v512_v30 = vpop.permute.xlu1 %511  ;;  %v528_v21 = vpop.permute.xlu0 %527  ;;  %v481_v56 = vmul.f32 %v1659_v18, %v1594_v0 }
  0xed   :  { %v1688_v59 = vmul.f32 %v632_v58, %v1462_v53  ;;  %v1691_v35 = vmul.f32 %v633_v48, %v1464_v54  ;;  %v596_v8 = vmul.f32 %v1645_v27, %v512_v30  ;;  %v597_v23 = vmul.f32 %v1647_v5, %v512_v30 }
  0xee   :  { %v604_v4 = vmul.f32 %v1645_v27, %v528_v21  ;;  %v605_v25 = vmul.f32 %v1647_v5, %v528_v21  ;;  %v298_v53 = vsub.f32 %v1478_v19, %v1433_v51  ;;  %v299_v58 = vsub.f32 %v1478_v19, %v1435_v52  ;;  %v2187_v21 = vld [vmem:[#allocation6_spill] sm:$0xff] }
  0xef   :  { %2184 = vst [vmem:[#allocation18_spill] sm:$0xff] %v1688_v59  ;;  %2185 = vst [vmem:[#allocation19_spill] sm:$0xff] %v1691_v35  ;;  %v630_v54 = vadd.f32 %v596_v8, %v476_v37  ;;  %v631_v28 = vadd.f32 %v597_v23, %v477_v40  ;;  %v2186_v40 = vld [vmem:[#allocation5_spill] sm:$0xff] }
  0xf0   :  { %v638_v48 = vadd.f32 %v604_v4, %v484_v44  ;;  %v639_v30 = vadd.f32 %v605_v25, %v485_v15  ;;  %v520_v35 = vpop.permute.xlu1 %519  ;;  %v536_v59 = vpop.permute.xlu0 %535  ;;  %v332_v44 = vmul.f32 %v298_v53, %v298_v53  ;;  %v333_v4 = vmul.f32 %v299_v58, %v299_v58 }
  0xf1   :  { %v1708_v11 = vmul.f32 %v630_v54, %v1450_v20  ;;  %v1711_v39 = vmul.f32 %v631_v28, %v1452_v22  ;;  %v600_v37 = vmul.f32 %v1645_v27, %v520_v35  ;;  %v601_v23 = vmul.f32 %v1647_v5, %v520_v35 }
  0xf2   :  { %v1717_v19 = vmul.f32 %v638_v48, %v2186_v40  ;;  %v1720_v8 = vmul.f32 %v639_v30, %v2187_v21  ;;  %v488_v20 = vmul.f32 %v1657_v60, %v1601_v7  ;;  %v608_v22 = vmul.f32 %v1645_v27, %v536_v59 }
  0xf3   :  { %v634_v15 = vadd.f32 %v600_v37, %v480_v36  ;;  %v489_v25 = vmul.f32 %v1659_v18, %v1601_v7  ;;  %v635_v0 = vadd.f32 %v601_v23, %v481_v56  ;;  %v609_v54 = vmul.f32 %v1647_v5, %v536_v59  ;;  %v2189_v56 = vld [vmem:[#allocation7_spill] sm:$0xff]  ;;  %v2190_v23 = vld [vmem:[#allocation8_spill] sm:$0xff] }
  0xf4   :  { %2188 = vst [vmem:[#allocation5_spill] sm:$0xff] %v1720_v8  ;;  %v524_v28 = vpop.permute.xlu1 %523  ;;  %v544_v48 = vpop.permute.xlu0 %543  ;;  %v482_v30 = vmul.f32 %v1657_v60, %v1599_v1  ;;  %v642_v53 = vadd.f32 %v608_v22, %v488_v20  ;;  %v483_v36 = vmul.f32 %v1659_v18, %v1599_v1  ;;  %v362_v59 = vadd.f32 %v328_v49, %v1663_v55  ;;  %v2191_v1 = vld [vmem:[#allocation9_spill] sm:$0xff] }
  0xf5   :  { %v1731_v35 = vmul.f32 %v634_v15, %v360_v61  ;;  %v602_v40 = vmul.f32 %v1645_v27, %v524_v28  ;;  %v1736_v58 = vmul.f32 %v635_v0, %v361_v47  ;;  %v643_v37 = vadd.f32 %v609_v54, %v489_v25 }
  0xf6   :  { %v603_v7 = vmul.f32 %v1647_v5, %v524_v28  ;;  %v302_v21 = vsub.f32 %v2189_v56, %v1433_v51  ;;  %v1743_v8 = vmul.f32 %v642_v53, %v2190_v23  ;;  %v363_v20 = vadd.f32 %v329_v50, %v1665_v16 }
  0xf7   :  { %v636_v61 = vadd.f32 %v602_v40, %v482_v30  ;;  %v303_v15 = vsub.f32 %v2189_v56, %v1435_v52  ;;  %v1749_v47 = vmul.f32 %v643_v37, %v2191_v1  ;;  %v366_v55 = vadd.f32 %v332_v44, %v1671_v31 }
  0xf8   :  { %v637_v22 = vadd.f32 %v603_v7, %v483_v36  ;;  %v532_v25 = vpop.permute.xlu1 %531  ;;  %v552_v0 = vpop.permute.xlu0 %551  ;;  %v492_v51 = vmul.f32 %v1657_v60, %v1606_v3  ;;  %v612_v54 = vmul.f32 %v1645_v27, %v544_v48  ;;  %v367_v16 = vadd.f32 %v333_v4, %v1673_v13 }
  0xf9   :  { %v1754_v49 = vmul.f32 %v636_v61, %v362_v59  ;;  %v493_v52 = vmul.f32 %v1659_v18, %v1606_v3  ;;  %v613_v28 = vmul.f32 %v1647_v5, %v544_v48  ;;  %v336_v30 = vmul.f32 %v302_v21, %v302_v21 }
  0xfa   :  { %v1760_v50 = vmul.f32 %v637_v22, %v363_v20  ;;  %v486_v31 = vmul.f32 %v1657_v60, %v1604_v24  ;;  %v646_v44 = vadd.f32 %v612_v54, %v492_v51  ;;  %v606_v53 = vmul.f32 %v1645_v27, %v532_v25 }
  0xfb   :  { %v337_v40 = vmul.f32 %v303_v15, %v303_v15  ;;  %v487_v36 = vmul.f32 %v1659_v18, %v1604_v24  ;;  %v647_v37 = vadd.f32 %v613_v28, %v493_v52  ;;  %v607_v13 = vmul.f32 %v1647_v5, %v532_v25 }
  0xfc   :  { %v540_v4 = vpop.permute.xlu1 %539  ;;  %v560_v3 = vpop.permute.xlu0 %559  ;;  %v496_v7 = vmul.f32 %v1657_v60, %v1611_v9  ;;  %v1772_v48 = vmul.f32 %v646_v44, %v1520_v41  ;;  %v640_v59 = vadd.f32 %v606_v53, %v486_v31  ;;  %v616_v56 = vmul.f32 %v1645_v27, %v552_v0 }
  0xfd   :  { %v497_v21 = vmul.f32 %v1659_v18, %v1611_v9  ;;  %v1778_v23 = vmul.f32 %v647_v37, %v1522_v34  ;;  %v641_v24 = vadd.f32 %v607_v13, %v487_v36  ;;  %v617_v61 = vmul.f32 %v1647_v5, %v552_v0 }
  0xfe   :  { %v490_v20 = vmul.f32 %v1657_v60, %v1609_v17  ;;  %v1783_v15 = vmul.f32 %v640_v59, %v366_v55  ;;  %v650_v1 = vadd.f32 %v616_v56, %v496_v7  ;;  %v610_v41 = vmul.f32 %v1645_v27, %v540_v4 }
  0xff   :  { %v491_v22 = vmul.f32 %v1659_v18, %v1609_v17  ;;  %v1788_v25 = vmul.f32 %v641_v24, %v367_v16  ;;  %v651_v9 = vadd.f32 %v617_v61, %v497_v21  ;;  %v611_v34 = vmul.f32 %v1647_v5, %v540_v4 }
 0x100   :  { %v548_v51 = vpop.permute.xlu1 %547  ;;  %v568_v54 = vpop.permute.xlu0 %567  ;;  %v370_v0 = vadd.f32 %v336_v30, %v1675_v46  ;;  %v1793_v52 = vmul.f32 %v650_v1, %v1534_v10  ;;  %v644_v55 = vadd.f32 %v610_v41, %v490_v20  ;;  %v371_v28 = vadd.f32 %v337_v40, %v1677_v57 }
 0x101   :  { %v1797_v31 = vmul.f32 %v651_v9, %v1536_v26  ;;  %v645_v44 = vadd.f32 %v611_v34, %v491_v22  ;;  %v500_v17 = vmul.f32 %v1657_v60, %v1615_v38  ;;  %v620_v53 = vmul.f32 %v1645_v27, %v560_v3 }
 0x102   :  { %v1801_v16 = vmul.f32 %v644_v55, %v370_v0  ;;  %v501_v46 = vmul.f32 %v1659_v18, %v1615_v38  ;;  %v621_v10 = vmul.f32 %v1647_v5, %v560_v3  ;;  %v494_v26 = vmul.f32 %v1657_v60, %v1613_v62 }
 0x103   :  { %v1806_v30 = vmul.f32 %v645_v44, %v371_v28  ;;  %v654_v40 = vadd.f32 %v620_v53, %v500_v17  ;;  %v614_v37 = vmul.f32 %v1645_v27, %v548_v51  ;;  %v495_v13 = vmul.f32 %v1659_v18, %v1613_v62 }
 0x104   :  { %v556_v36 = vpop.permute.xlu1 %555  ;;  %v576_v57 = vpop.permute.xlu0 %575  ;;  %v655_v4 = vadd.f32 %v621_v10, %v501_v46  ;;  %v615_v7 = vmul.f32 %v1647_v5, %v548_v51  ;;  %v504_v38 = vmul.f32 %v1657_v60, %v1623_v45  ;;  %v624_v56 = vmul.f32 %v1645_v27, %v568_v54  ;;  %v2192_v46 = vld [vmem:[#allocation16_spill] sm:$0xff] }
 0x105   :  { %v1818_v59 = vmul.f32 %v654_v40, %v1556_v42  ;;  %v648_v3 = vadd.f32 %v614_v37, %v494_v26  ;;  %v505_v21 = vmul.f32 %v1659_v18, %v1623_v45  ;;  %v625_v62 = vmul.f32 %v1647_v5, %v568_v54 }
 0x106   :  { %v1824_v24 = vmul.f32 %v655_v4, %v1558_v6  ;;  %v649_v61 = vadd.f32 %v615_v7, %v495_v13  ;;  %v498_v1 = vmul.f32 %v1657_v60, %v1621_v14  ;;  %v658_v42 = vadd.f32 %v624_v56, %v504_v38  ;;  %v2193_v13 = vld [vmem:[#allocation17_spill] sm:$0xff]  ;;  %v2194_v4 = vld [vmem:[#allocation18_spill] sm:$0xff] }
 0x107   :  { %v1830_v41 = vmul.f32 %v648_v3, %v1527_v63  ;;  %v618_v22 = vmul.f32 %v1645_v27, %v556_v36  ;;  %v499_v45 = vmul.f32 %v1659_v18, %v1621_v14  ;;  %v659_v34 = vadd.f32 %v625_v62, %v505_v21  ;;  %v2195_v7 = vld [vmem:[#allocation14_spill] sm:$0xff]  ;;  %v2196_v21 = vld [vmem:[#allocation19_spill] sm:$0xff] }
 0x108   :  { %v564_v20 = vpop.permute.xlu1 %563  ;;  %v1838_v6 = vmul.f32 %v649_v61, %v1529_v2  ;;  %v619_v51 = vmul.f32 %v1647_v5, %v556_v36  ;;  %v1842_v54 = vmul.f32 %v658_v42, %v1574_v32  ;;  %v508_v44 = vmul.f32 %v1657_v60, %v1635_v33  ;;  %v2197_v62 = vld [vmem:[#allocation15_spill] sm:$0xff] }
 0x109   :  { %v1833_v9 = vpop.permute.xlu0 %703  ;;  %v652_v0 = vadd.f32 %v618_v22, %v498_v1  ;;  %v1845_v63 = vmul.f32 %v659_v34, %v1576_v29  ;;  %v628_v2 = vmul.f32 %v1645_v27, %v576_v57  ;;  %v509_v32 = vmul.f32 %v1659_v18, %v1635_v33 }
 0x10a   :  { %v653_v55 = vadd.f32 %v619_v51, %v499_v45  ;;  %v629_v29 = vmul.f32 %v1647_v5, %v576_v57  ;;  %v502_v10 = vmul.f32 %v1657_v60, %v2192_v46  ;;  %v622_v26 = vmul.f32 %v1645_v27, %v564_v20  ;;  %v2198_v45 = vld [vmem:[#allocation10_spill] sm:$0xff] }
 0x10b   :  { %v1850_v14 = vmul.f32 %v652_v0, %v1549_v43  ;;  %v662_v36 = vadd.f32 %v628_v2, %v508_v44  ;;  %v503_v43 = vmul.f32 %v1659_v18, %v2192_v46  ;;  %v623_v37 = vmul.f32 %v1647_v5, %v564_v20  ;;  %v2199_v44 = vld [vmem:[#allocation11_spill] sm:$0xff] }
 0x10c   :  { %v572_v28 = vpop.permute.xlu1 %571  ;;  %v1858_v53 = vmul.f32 %v653_v55, %v1551_v12  ;;  %v663_v40 = vadd.f32 %v629_v29, %v509_v32  ;;  %v506_v33 = vmul.f32 %v1657_v60, %v2193_v13  ;;  %v940_v12 = vmul.f32 1.442695, %v2194_v4 }
 0x10d   :  { %v1853_v17 = vpop.permute.xlu0 %715  ;;  %v1871_v38 = vmul.f32 %v662_v36, %v2195_v7  ;;  %v656_v57 = vadd.f32 %v622_v26, %v502_v10  ;;  %v507_v56 = vmul.f32 %v1659_v18, %v2193_v13  ;;  %v942_v61 = vmul.f32 1.442695, %v2196_v21 }
 0x10e   :  { %v1879_v1 = vmul.f32 %v663_v40, %v2197_v62  ;;  %v657_v20 = vadd.f32 %v623_v37, %v503_v43  ;;  %v936_v22 = vmul.f32 1.442695, %v1708_v11  ;;  %v626_v51 = vmul.f32 %v1645_v27, %v572_v28  ;;  %v2200_v11 = vld [vmem:[#allocation5_spill] sm:$0xff]  ;;  %v2201_v43 = vld [vmem:[#allocation12_spill] sm:$0xff] }
 0x10f   :  { %v1885_v34 = vmul.f32 %v656_v57, %v2198_v45  ;;  %v627_v0 = vmul.f32 %v1647_v5, %v572_v28  ;;  %v938_v55 = vmul.f32 1.442695, %v1711_v39  ;;  %1109 = vpow2.f32 %v940_v12  ;;  %v2202_v40 = vld [vmem:[#allocation13_spill] sm:$0xff] }
 0x110   :  { %v1891_v2 = vmul.f32 %v657_v20, %v2199_v44  ;;  %v952_v32 = vmul.f32 1.442695, %v1717_v19  ;;  %v660_v29 = vadd.f32 %v626_v51, %v506_v33  ;;  %1111 = vpow2.f32 %v942_v61 }
 0x111   :  { %v1873_v3 = vpop.permute.xlu1 %699  ;;  %v1881_v42 = vpop.permute.xlu0 %723  ;;  %v661_v46 = vadd.f32 %v627_v0, %v507_v56  ;;  %v954_v36 = vmul.f32 1.442695, %v2200_v11  ;;  %1113 = vpow2.f32 %v936_v22  ;;  %v944_v28 = vmul.f32 1.442695, %v1731_v35 }
 0x112   :  { %v1901_v39 = vmul.f32 %v660_v29, %v2201_v43  ;;  %1115 = vpow2.f32 %v938_v55  ;;  %v946_v19 = vmul.f32 1.442695, %v1736_v58  ;;  %v960_v13 = vmul.f32 1.442695, %v1743_v8 }
 0x113   :  { %v1904_v37 = vmul.f32 %v661_v46, %v2202_v40  ;;  %1117 = vpow2.f32 %v952_v32  ;;  %v962_v4 = vmul.f32 1.442695, %v1749_v47  ;;  %v948_v35 = vmul.f32 1.442695, %v1754_v49 }
 0x114   :  { %1119 = vpow2.f32 %v954_v36  ;;  %v950_v7 = vmul.f32 1.442695, %v1760_v50  ;;  %v968_v57 = vmul.f32 1.442695, %v1772_v48  ;;  %v970_v8 = vmul.f32 1.442695, %v1778_v23 }
 0x115   :  { %v1894_v10 = vpop.permute.xlu1 %707  ;;  %v1897_v26 = vpop.permute.xlu0 %731  ;;  %1121 = vpow2.f32 %v944_v28  ;;  %v956_v47 = vmul.f32 1.442695, %v1783_v15  ;;  %v958_v49 = vmul.f32 1.442695, %v1788_v25  ;;  %v976_v48 = vmul.f32 1.442695, %v1793_v52 }
 0x116   :  { %1123 = vpow2.f32 %v946_v19  ;;  %v978_v20 = vmul.f32 1.442695, %v1797_v31  ;;  %v964_v45 = vmul.f32 1.442695, %v1801_v16  ;;  %v966_v51 = vmul.f32 1.442695, %v1806_v30 }
 0x117   :  { %1125 = vpow2.f32 %v960_v13  ;;  %v984_v0 = vmul.f32 1.442695, %v1818_v59  ;;  %v986_v44 = vmul.f32 1.442695, %v1824_v24  ;;  %v972_v29 = vmul.f32 1.442695, %v1830_v41 }
 0x118   :  { %1127 = vpow2.f32 %v962_v4  ;;  %v974_v59 = vmul.f32 1.442695, %v1838_v6  ;;  %v992_v24 = vmul.f32 1.442695, %v1842_v54  ;;  %v994_v41 = vmul.f32 1.442695, %v1845_v63 }
 0x119   :  { %v1908_v33 = vpop.permute.xlu1 %711  ;;  %v1911_v12 = vpop.permute.xlu0 %739  ;;  %1129 = vpow2.f32 %v948_v35  ;;  %v768_v19 = vmul.f32 %v1833_v9, %v1657_v60  ;;  %v769_v6 = vmul.f32 %v1833_v9, %v1659_v18  ;;  %v980_v54 = vmul.f32 1.442695, %v1850_v14 }
 0x11a   :  { %v1921_v21 = vpop.eup %1109  ;;  %1131 = vpow2.f32 %v950_v7  ;;  %v1000_v9 = vmul.f32 1.442695, %v1871_v38  ;;  %v775_v14 = vmul.f32 %v1853_v17, %v1659_v18  ;;  %v1002_v38 = vmul.f32 1.442695, %v1879_v1 }
 0x11b   :  { %v1924_v61 = vpop.eup %1111  ;;  %1133 = vpow2.f32 %v968_v57  ;;  %v982_v57 = vmul.f32 1.442695, %v1858_v53 }
 0x11c   :  { %v1927_v50 = vpop.eup %1113  ;;  %1135 = vpow2.f32 %v970_v8 }
 0x11d   :  { %v1916_v58 = vpop.permute.xlu1 %719  ;;  %v1919_v56 = vpop.permute.xlu0 %747  ;;  %1137 = vpow2.f32 %v956_v47 }
 0x11e   :  { %v1932_v23 = vpop.eup %1115  ;;  %1139 = vpow2.f32 %v958_v49 }
 0x11f   :  { %v1937_v15 = vpop.eup %1117  ;;  %1141 = vpow2.f32 %v976_v48  ;;  %v774_v48 = vmul.f32 %v1853_v17, %v1657_v60 }
 0x120   :  { %v1940_v25 = vpop.eup %1119  ;;  %1143 = vpow2.f32 %v978_v20 }
 0x121   :  { %v1930_v62 = vpop.permute.xlu1 %727  ;;  %v1935_v22 = vpop.permute.xlu0 %755  ;;  %1145 = vpow2.f32 %v964_v45 }
 0x122   :  { %v1943_v52 = vpop.eup %1121  ;;  %1147 = vpow2.f32 %v966_v51 }
 0x123   :  { %v1948_v31 = vpop.eup %1123  ;;  %1149 = vpow2.f32 %v984_v0 }
 0x124   :  { %v1953_v16 = vpop.eup %1125  ;;  %1151 = vpow2.f32 %v986_v44 }
 0x125   :  { %v1946_v55 = vpop.permute.xlu1 %735  ;;  %v1951_v32 = vpop.permute.xlu0 %763  ;;  %1153 = vpow2.f32 %v972_v29 }
 0x126   :  { %v1956_v30 = vpop.eup %1127  ;;  %1155 = vpow2.f32 %v974_v59 }
 0x127   :  { %v1958_v46 = vpop.eup %1129  ;;  %1157 = vpow2.f32 %v992_v24 }
 0x128   :  { %v1963_v36 = vpop.eup %1131  ;;  %1159 = vpow2.f32 %v994_v41 }
 0x129   :  { %v1961_v11 = vpop.permute.xlu1 %743  ;;  %v1966_v28 = vpop.eup %1133  ;;  %1161 = vpow2.f32 %v980_v54 }
 0x12a   :  { %v806_v43 = vpop.permute.xlu0 %805  ;;  %v1969_v40 = vpop.eup %1135  ;;  %1163 = vpow2.f32 %v982_v57 }
 0x12b   :  { %v870_v13 = vmul.f32 %v806_v43, %v1645_v27  ;;  %v871_v4 = vmul.f32 %v806_v43, %v1647_v5  ;;  %v1977_v35 = vpop.eup %1137  ;;  %1165 = vpow2.f32 %v1000_v9  ;;  %v779_v43 = vmul.f32 %v1881_v42, %v1659_v18 }
 0x12c   :  { %v1982_v63 = vpop.eup %1139  ;;  %1167 = vpow2.f32 %v1002_v38 }
 0x12d   :  { %v1980_v7 = vpop.permute.xlu1 %751  ;;  %v904_v8 = vadd.f32 %v870_v13, %v768_v19  ;;  %v905_v47 = vadd.f32 %v871_v4, %v769_v6  ;;  %v1985_v49 = vpop.eup %1141 }
 0x12e   :  { %v818_v20 = vpop.permute.xlu0 %817  ;;  %v1992_v45 = vpop.eup %1143 }
 0x12f   :  { %v1006_v51 = vmul.f32 %v1921_v21, %v904_v8  ;;  %v1007_v53 = vmul.f32 %v1924_v61, %v905_v47  ;;  %v876_v0 = vmul.f32 %v818_v20, %v1645_v27  ;;  %v877_v44 = vmul.f32 %v818_v20, %v1647_v5  ;;  %v1998_v29 = vpop.eup %1145 }
 0x130   :  { %v2003_v24 = vpop.eup %1147  ;;  %v778_v61 = vmul.f32 %v1881_v42, %v1657_v60  ;;  %v2020_v8 = vmul.f32 1.442695, %v1885_v34  ;;  %v2023_v47 = vmul.f32 1.442695, %v1891_v2  ;;  %v766_v42 = vmul.f32 %v1873_v3, %v1657_v60 }
 0x131   :  { %v2001_v59 = vpop.permute.xlu1 %759  ;;  %1040 = vst [vmem:[#allocation2 + $0x10] sm:$0xff] %v1006_v51  ;;  %1041 = vst [vmem:[#allocation2 + $0x18] sm:$0xff] %v1007_v53  ;;  %v910_v17 = vadd.f32 %v876_v0, %v774_v48  ;;  %v911_v21 = vadd.f32 %v877_v44, %v775_v14  ;;  %v2005_v41 = vpop.eup %1149  ;;  %v782_v34 = vmul.f32 %v1897_v26, %v1657_v60 }
 0x132   :  { %v2011_v1 = vpop.eup %1151  ;;  %v783_v2 = vmul.f32 %v1897_v26, %v1659_v18  ;;  %v770_v26 = vmul.f32 %v1894_v10, %v1657_v60  ;;  %1169 = vpow2.f32 %v2020_v8 }
 0x133   :  { %v826_v19 = vpop.permute.xlu0 %825  ;;  %v1012_v6 = vmul.f32 %v1937_v15, %v910_v17  ;;  %v1013_v13 = vmul.f32 %v1940_v25, %v911_v21  ;;  %v2017_v57 = vpop.eup %1153  ;;  %v767_v15 = vmul.f32 %v1873_v3, %v1659_v18  ;;  %1171 = vpow2.f32 %v2023_v47 }
 0x134   :  { %v880_v4 = vmul.f32 %v826_v19, %v1645_v27  ;;  %v881_v54 = vmul.f32 %v826_v19, %v1647_v5  ;;  %v2029_v14 = vpop.eup %1155 }
 0x135   :  { %1046 = vst [vmem:[#allocation2 + $0x40] sm:$0xff] %v1012_v6  ;;  %1047 = vst [vmem:[#allocation2 + $0x48] sm:$0xff] %v1013_v13  ;;  %v2037_v0 = vpop.eup %1157  ;;  %v786_v6 = vmul.f32 %v1911_v12, %v1657_v60 }
 0x136   :  { %v914_v25 = vadd.f32 %v880_v4, %v778_v61  ;;  %v915_v9 = vadd.f32 %v881_v54, %v779_v43  ;;  %v802_v48 = vpop.permute.xlu1 %801  ;;  %v2043_v21 = vpop.eup %1159  ;;  %v771_v61 = vmul.f32 %v1894_v10, %v1659_v18 }
 0x137   :  { %v868_v20 = vmul.f32 %v802_v48, %v1645_v27  ;;  %v869_v51 = vmul.f32 %v802_v48, %v1647_v5  ;;  %v834_v53 = vpop.permute.xlu0 %833  ;;  %v2053_v54 = vpop.eup %1161 }
 0x138   :  { %v1016_v3 = vmul.f32 %v1953_v16, %v914_v25  ;;  %v1017_v44 = vmul.f32 %v1956_v30, %v915_v9  ;;  %v884_v38 = vmul.f32 %v834_v53, %v1645_v27  ;;  %v885_v17 = vmul.f32 %v834_v53, %v1647_v5  ;;  %v2059_v48 = vpop.eup %1163 }
 0x139   :  { %v902_v43 = vadd.f32 %v868_v20, %v766_v42  ;;  %v903_v19 = vadd.f32 %v869_v51, %v767_v15  ;;  %v787_v16 = vmul.f32 %v1911_v12, %v1659_v18  ;;  %v2065_v51 = vpop.eup %1165 }
 0x13a   :  { %1050 = vst [vmem:[#allocation2 + $0x60] sm:$0xff] %v1016_v3  ;;  %1051 = vst [vmem:[#allocation2 + $0x68] sm:$0xff] %v1017_v44  ;;  %v918_v30 = vadd.f32 %v884_v38, %v782_v34  ;;  %v919_v13 = vadd.f32 %v885_v17, %v783_v2  ;;  %v810_v4 = vpop.permute.xlu1 %809 }
 0x13b   :  { %v1004_v25 = vmul.f32 %v1927_v50, %v902_v43  ;;  %v1005_v9 = vmul.f32 %v1932_v23, %v903_v19  ;;  %v872_v10 = vmul.f32 %v810_v4, %v1645_v27  ;;  %v873_v42 = vmul.f32 %v810_v4, %v1647_v5  ;;  %v842_v15 = vpop.permute.xlu0 %841  ;;  %v2075_v43 = vpop.eup %1167 }
 0x13c   :  { %v1020_v12 = vmul.f32 %v1966_v28, %v918_v30  ;;  %v1021_v20 = vmul.f32 %v1969_v40, %v919_v13  ;;  %v888_v34 = vmul.f32 %v842_v15, %v1645_v27  ;;  %v889_v2 = vmul.f32 %v842_v15, %v1647_v5 }
 0x13d   :  { %v772_v50 = vmul.f32 %v1908_v33, %v1657_v60  ;;  %v773_v23 = vmul.f32 %v1908_v33, %v1659_v18  ;;  %1038 = vst [vmem:[#allocation2] sm:$0xff] %v1004_v25  ;;  %1039 = vst [vmem:[#allocation2 + $0x8] sm:$0xff] %v1005_v9  ;;  %v906_v53 = vadd.f32 %v872_v10, %v770_v26 }
 0x13e   :  { %v907_v3 = vadd.f32 %v873_v42, %v771_v61  ;;  %v790_v28 = vmul.f32 %v1919_v56, %v1657_v60  ;;  %v791_v40 = vmul.f32 %v1919_v56, %v1659_v18  ;;  %1054 = vst [vmem:[#allocation2 + $0x80] sm:$0xff] %v1020_v12  ;;  %1055 = vst [vmem:[#allocation2 + $0x88] sm:$0xff] %v1021_v20  ;;  %v814_v17 = vpop.permute.xlu1 %813 }
 0x13f   :  { %v922_v44 = vadd.f32 %v888_v34, %v786_v6  ;;  %v923_v38 = vadd.f32 %v889_v2, %v787_v16  ;;  %v1008_v19 = vmul.f32 %v1943_v52, %v906_v53  ;;  %v874_v26 = vmul.f32 %v814_v17, %v1645_v27  ;;  %v850_v30 = vpop.permute.xlu0 %849 }
 0x140   :  { %v1009_v33 = vmul.f32 %v1948_v31, %v907_v3  ;;  %v875_v61 = vmul.f32 %v814_v17, %v1647_v5  ;;  %v892_v4 = vmul.f32 %v850_v30, %v1645_v27  ;;  %v893_v6 = vmul.f32 %v850_v30, %v1647_v5 }
 0x141   :  { %v1024_v13 = vmul.f32 %v1985_v49, %v922_v44  ;;  %v1025_v56 = vmul.f32 %v1992_v45, %v923_v38  ;;  %v776_v16 = vmul.f32 %v1916_v58, %v1657_v60  ;;  %v777_v52 = vmul.f32 %v1916_v58, %v1659_v18  ;;  %1042 = vst [vmem:[#allocation2 + $0x20] sm:$0xff] %v1008_v19 }
 0x142   :  { %1043 = vst [vmem:[#allocation2 + $0x28] sm:$0xff] %v1009_v33  ;;  %v908_v31 = vadd.f32 %v874_v26, %v772_v50  ;;  %v909_v25 = vadd.f32 %v875_v61, %v773_v23  ;;  %v794_v9 = vmul.f32 %v1935_v22, %v1657_v60  ;;  %v795_v49 = vmul.f32 %v1935_v22, %v1659_v18  ;;  %v822_v42 = vpop.permute.xlu1 %821 }
 0x143   :  { %1058 = vst [vmem:[#allocation2 + $0xa0] sm:$0xff] %v1024_v13  ;;  %1059 = vst [vmem:[#allocation2 + $0xa8] sm:$0xff] %v1025_v56  ;;  %v926_v45 = vadd.f32 %v892_v4, %v790_v28  ;;  %v927_v10 = vadd.f32 %v893_v6, %v791_v40  ;;  %v878_v58 = vmul.f32 %v822_v42, %v1645_v27  ;;  %v858_v34 = vpop.permute.xlu0 %857  ;;  %v996_v13 = vmul.f32 1.442695, %v1901_v39 }
 0x144   :  { %v1010_v15 = vmul.f32 %v1958_v46, %v908_v31  ;;  %v1011_v12 = vmul.f32 %v1963_v36, %v909_v25  ;;  %v879_v20 = vmul.f32 %v822_v42, %v1647_v5  ;;  %v896_v22 = vmul.f32 %v858_v34, %v1645_v27 }
 0x145   :  { %v1028_v2 = vmul.f32 %v2005_v41, %v926_v45  ;;  %v1029_v50 = vmul.f32 %v2011_v1, %v927_v10  ;;  %v897_v23 = vmul.f32 %v858_v34, %v1647_v5  ;;  %v780_v53 = vmul.f32 %v1930_v62, %v1657_v60 }
 0x146   :  { %v781_v46 = vmul.f32 %v1930_v62, %v1659_v18  ;;  %1044 = vst [vmem:[#allocation2 + $0x30] sm:$0xff] %v1010_v15  ;;  %1045 = vst [vmem:[#allocation2 + $0x38] sm:$0xff] %v1011_v12  ;;  %v912_v36 = vadd.f32 %v878_v58, %v776_v16  ;;  %v913_v3 = vadd.f32 %v879_v20, %v777_v52  ;;  %v830_v44 = vpop.permute.xlu1 %829  ;;  %v998_v31 = vmul.f32 1.442695, %v1904_v37  ;;  %v1170_v58 = vpop.eup %1169 }
 0x147   :  { %v798_v28 = vmul.f32 %v1951_v32, %v1657_v60  ;;  %v799_v41 = vmul.f32 %v1951_v32, %v1659_v18  ;;  %1062 = vst [vmem:[#allocation2 + $0xc0] sm:$0xff] %v1028_v2  ;;  %1063 = vst [vmem:[#allocation2 + $0xc8] sm:$0xff] %v1029_v50  ;;  %v930_v1 = vadd.f32 %v896_v22, %v794_v9  ;;  %v866_v33 = vpop.permute.xlu0 %865  ;;  %1173 = vpow2.f32 %v996_v13  ;;  %v1172_v22 = vpop.eup %1171 }
 0x148   :  { %v931_v40 = vadd.f32 %v897_v23, %v795_v49  ;;  %v1014_v38 = vmul.f32 %v1977_v35, %v912_v36  ;;  %v1015_v17 = vmul.f32 %v1982_v63, %v913_v3  ;;  %v882_v62 = vmul.f32 %v830_v44, %v1645_v27 }
 0x149   :  { %v883_v19 = vmul.f32 %v830_v44, %v1647_v5  ;;  %v1032_v26 = vmul.f32 %v2037_v0, %v930_v1  ;;  %v900_v32 = vmul.f32 %v866_v33, %v1645_v27  ;;  %v901_v30 = vmul.f32 %v866_v33, %v1647_v5 }
 0x14a   :  { %v1033_v61 = vmul.f32 %v2043_v21, %v931_v40  ;;  %1048 = vst [vmem:[#allocation2 + $0x50] sm:$0xff] %v1014_v38  ;;  %1049 = vst [vmem:[#allocation2 + $0x58] sm:$0xff] %v1015_v17  ;;  %v916_v35 = vadd.f32 %v882_v62, %v780_v53  ;;  %v784_v56 = vmul.f32 %v1946_v55, %v1657_v60  ;;  %v838_v6 = vpop.permute.xlu1 %837  ;;  %1175 = vpow2.f32 %v998_v31 }
 0x14b   :  { %v917_v63 = vadd.f32 %v883_v19, %v781_v46  ;;  %v785_v0 = vmul.f32 %v1946_v55, %v1659_v18  ;;  %1066 = vst [vmem:[#allocation2 + $0xe0] sm:$0xff] %v1032_v26  ;;  %v934_v21 = vadd.f32 %v900_v32, %v798_v28  ;;  %v935_v4 = vadd.f32 %v901_v30, %v799_v41 }
 0x14c   :  { %1067 = vst [vmem:[#allocation2 + $0xe8] sm:$0xff] %v1033_v61  ;;  %v1018_v16 = vmul.f32 %v1998_v29, %v916_v35  ;;  %v886_v39 = vmul.f32 %v838_v6, %v1645_v27  ;;  %v887_v52 = vmul.f32 %v838_v6, %v1647_v5  ;;  %v788_v29 = vmul.f32 %v1961_v11, %v1657_v60 }
 0x14d   :  { %v1019_v8 = vmul.f32 %v2003_v24, %v917_v63  ;;  %v1036_v25 = vmul.f32 %v2065_v51, %v934_v21  ;;  %v1037_v55 = vmul.f32 %v2075_v43, %v935_v4  ;;  %v789_v24 = vmul.f32 %v1961_v11, %v1659_v18 }
 0x14e   :  { %1052 = vst [vmem:[#allocation2 + $0x70] sm:$0xff] %v1018_v16  ;;  %v920_v9 = vadd.f32 %v886_v39, %v784_v56  ;;  %v921_v49 = vadd.f32 %v887_v52, %v785_v0  ;;  %v846_v47 = vpop.permute.xlu1 %845  ;;  %v792_v15 = vmul.f32 %v1980_v7, %v1657_v60  ;;  %v793_v11 = vmul.f32 %v1980_v7, %v1659_v18 }
 0x14f   :  { %1053 = vst [vmem:[#allocation2 + $0x78] sm:$0xff] %v1019_v8  ;;  %1070 = vst [vmem:[#allocation2 + $0x100] sm:$0xff] %v1036_v25  ;;  %v890_v43 = vmul.f32 %v846_v47, %v1645_v27  ;;  %v891_v45 = vmul.f32 %v846_v47, %v1647_v5  ;;  %v796_v23 = vmul.f32 %v2001_v59, %v1657_v60 }
 0x150   :  { %1071 = vst [vmem:[#allocation2 + $0x108] sm:$0xff] %v1037_v55  ;;  %v1022_v37 = vmul.f32 %v2017_v57, %v920_v9  ;;  %v1023_v51 = vmul.f32 %v2029_v14, %v921_v49  ;;  %v797_v7 = vmul.f32 %v2001_v59, %v1659_v18 }
 0x151   :  { %v924_v10 = vadd.f32 %v890_v43, %v788_v29  ;;  %v925_v42 = vadd.f32 %v891_v45, %v789_v24  ;;  %v1174_v3 = vpop.eup %1173 }
 0x152   :  { %1056 = vst [vmem:[#allocation2 + $0x90] sm:$0xff] %v1022_v37  ;;  %1057 = vst [vmem:[#allocation2 + $0x98] sm:$0xff] %v1023_v51  ;;  %v854_v12 = vpop.permute.xlu1 %853 }
 0x153   :  { %v1026_v57 = vmul.f32 %v2053_v54, %v924_v10  ;;  %v1027_v14 = vmul.f32 %v2059_v48, %v925_v42  ;;  %v894_v20 = vmul.f32 %v854_v12, %v1645_v27  ;;  %v895_v34 = vmul.f32 %v854_v12, %v1647_v5 }
 0x154   :  { %v1176_v1 = vpop.eup %1175 }
 0x155   :  { %1060 = vst [vmem:[#allocation2 + $0xb0] sm:$0xff] %v1026_v57  ;;  %1061 = vst [vmem:[#allocation2 + $0xb8] sm:$0xff] %v1027_v14  ;;  %v928_v2 = vadd.f32 %v894_v20, %v792_v15  ;;  %v929_v50 = vadd.f32 %v895_v34, %v793_v11 }
 0x156   :  { %v862_v53 = vpop.permute.xlu1 %861 }
 0x157   :  { %v1030_v46 = vmul.f32 %v1170_v58, %v928_v2  ;;  %v1031_v54 = vmul.f32 %v1172_v22, %v929_v50  ;;  %v898_v48 = vmul.f32 %v862_v53, %v1645_v27  ;;  %v899_v36 = vmul.f32 %v862_v53, %v1647_v5 }
 0x159   :  { %1064 = vst [vmem:[#allocation2 + $0xd0] sm:$0xff] %v1030_v46  ;;  %1065 = vst [vmem:[#allocation2 + $0xd8] sm:$0xff] %v1031_v54  ;;  %v932_v28 = vadd.f32 %v898_v48, %v796_v23  ;;  %v933_v41 = vadd.f32 %v899_v36, %v797_v7 }
 0x15b   :  { %v1034_v40 = vmul.f32 %v1174_v3, %v932_v28  ;;  %v1035_v60 = vmul.f32 %v1176_v1, %v933_v41 }
 0x15d   :  { %1068 = vst [vmem:[#allocation2 + $0xf0] sm:$0xff] %v1034_v40  ;;  %1069 = vst [vmem:[#allocation2 + $0xf8] sm:$0xff] %v1035_v60 }
 0x15e   :  { %1188 = shalt.err (!%p1185_p4)
}
 0x15f   :  { %s1189_s20 = scalar_lea.hbm %s2167_s2, 4352 }
 0x160   :  { %p1190_p5 = scmp.ne.s32.totalorder %s2167_s2, %s1189_s20  ;;  %p1193_p6 = scmp.lt.u32.totalorder %s1189_s20, %s2167_s2 }
 0x162   :  { %p1195_p7 = pnand %p1193_p6, %p1190_p5 }
 0x164   :  { %1198 = shalt.err (!%p1195_p7)
}
 0x165   :  { %s1208_s25 = smov 256   ;;  %s1209_s26 = smov 16  }
 0x166   :  { %1083 = dma.vmem_to_hbm [thread:$0]  %s1078_s16, 4352, %s2167_s2, [#allocation3], %s1208_s25, %s1208_s25, %s1209_s26  }
 0x167   :  { %1199 = dma.done.wait [#allocation3], 4352  }
 0x168   :  { %1200 = vsyncadd [#allocation3], 4294962944 }
 0x169   :  { %1087 = vsyncpa [#allocation3], 1 }

</bundles_post_ra>
